<compile_context>
chip_gen: v6e
topology: v6e:2x2x1
jax: 0.10.0
libtpu: 0.0.40
codegen_flags: <defaults>
</compile_context>

<pallas_src>
import functools

import jax
import jax.numpy as jnp
from jax.experimental import pallas as pl
from jax.experimental.pallas import tpu as pltpu


# ----------------------------------------------------------------------------
# Small helpers
# ----------------------------------------------------------------------------
def _round_up(n, m):
    return ((n + m - 1) // m) * m


def _pad2(a, rows, cols):
    return jnp.pad(a, ((0, rows - a.shape[0]), (0, cols - a.shape[1])))


# ----------------------------------------------------------------------------
# Fused encoder kernel (built per (n_hidden, z_pad) configuration)
# ----------------------------------------------------------------------------
def _make_encoder_kernel(n_hidden, z_pad):
    def kernel(*refs):
        # refs: x, (w_i, b_i) * n_hidden, w_head, b_head, eps, out
        x_ref = refs[0]
        idx = 1
        h = x_ref[...]
        # Hidden stack: relu(h @ W + b). Python loop unrolls at trace time.
        for _ in range(n_hidden):
            w_ref, b_ref = refs[idx], refs[idx + 1]
            idx += 2
            h = jnp.maximum(
                jnp.dot(h, w_ref[...], preferred_element_type=jnp.float32)
                + b_ref[...],
                0.0,
            )
        w_head_ref, b_head_ref = refs[idx], refs[idx + 1]
        idx += 2
        eps_ref = refs[idx]
        out_ref = refs[idx + 1]

        # Single fused head matmul: [.., :Zp] -> mu, [.., Zp:] -> log_var branch.
        head = (
            jnp.dot(h, w_head_ref[...], preferred_element_type=jnp.float32)
            + b_head_ref[...]
        )
        mu = head[:, :z_pad]
        log_var = jax.nn.softplus(head[:, z_pad:])
        z = mu + jnp.exp(0.5 * log_var) * eps_ref[...]

        # Lane-dense stores: each slice is 128-lane aligned -> unmasked vst.
        out_ref[:, 0:z_pad] = z.astype(out_ref.dtype)
        out_ref[:, z_pad:2 * z_pad] = mu.astype(out_ref.dtype)
        out_ref[:, 2 * z_pad:3 * z_pad] = log_var.astype(out_ref.dtype)

    return kernel


# ----------------------------------------------------------------------------
# Parameter init (logical sizes, mirrors nn.Linear shapes transposed)
# ----------------------------------------------------------------------------
def init_encoder_params(key, dims):
    """dims = [x_dim, [hidden_dims], z_dim]."""
    x_dim, h_dims, z_dim = dims
    neuron_dims = [x_dim, *h_dims]
    params = {"hidden": []}
    for i in range(1, len(neuron_dims)):
        key, kw, kb = jax.random.split(key, 3)
        fan_in, fan_out = neuron_dims[i - 1], neuron_dims[i]
        w = jax.random.normal(kw, (fan_in, fan_out), jnp.float32) * (1.0 / jnp.sqrt(fan_in))
        b = jax.random.normal(kb, (1, fan_out), jnp.float32) * 0.01
        params["hidden"].append((w, b))
    h_last = h_dims[-1]
    key, k1, k2, k3, k4 = jax.random.split(key, 5)
    params["mu"] = (
        jax.random.normal(k1, (h_last, z_dim), jnp.float32) * (1.0 / jnp.sqrt(h_last)),
        jax.random.normal(k2, (1, z_dim), jnp.float32) * 0.01,
    )
    params["log_var"] = (
        jax.random.normal(k3, (h_last, z_dim), jnp.float32) * (1.0 / jnp.sqrt(h_last)),
        jax.random.normal(k4, (1, z_dim), jnp.float32) * 0.01,
    )
    return params


def pad_encoder_params(params, dims, lane=128):
    """Zero-pad every feature dim to a multiple of `lane` and fuse the head.

    Zero padding is exact: padded input features are zero, padded weight
    rows/cols are zero, padded biases are zero, and ReLU(0) = 0, so padded
    lanes never contaminate the real lanes; we simply slice them off at the end.
    """
    x_dim, h_dims, z_dim = dims
    x_pad = _round_up(x_dim, lane)
    h_pads = [_round_up(h, lane) for h in h_dims]
    z_pad = _round_up(z_dim, lane)

    in_pads = [x_pad, *h_pads[:-1]]
    hidden = []
    for (w, b), ip, op in zip(params["hidden"], in_pads, h_pads):
        hidden.append((_pad2(w, ip, op), _pad2(b, 1, op)))

    w_mu, b_mu = params["mu"]
    w_lv, b_lv = params["log_var"]
    h_last_pad = h_pads[-1]
    w_head = jnp.concatenate(
        [_pad2(w_mu, h_last_pad, z_pad), _pad2(w_lv, h_last_pad, z_pad)], axis=1
    )
    b_head = jnp.concatenate([_pad2(b_mu, 1, z_pad), _pad2(b_lv, 1, z_pad)], axis=1)

    return {
        "hidden": hidden,
        "head": (w_head, b_head),
        "x_pad": x_pad,
        "z_pad": z_pad,
        "x_dim": x_dim,
        "z_dim": z_dim,
    }


# ----------------------------------------------------------------------------
# Fused forward pass: single pallas_call, batch-tiled grid
# ----------------------------------------------------------------------------
def encoder_forward(padded, x, eps, *, batch_tile=None):
    """Returns (z, mu, log_var) exactly like Encoder.forward -> GaussianSample."""
    B = x.shape[0]
    x_dim, z_dim = padded["x_dim"], padded["z_dim"]
    x_pad, z_pad = padded["x_pad"], padded["z_pad"]

    # Batch tile: multiple of 8 sublanes; cap so VMEM stays tiny even on v7x
    # (64 MiB). For realistic batches grid>1 and the "parallel" axis lets the
    # two v7x TensorCores split the work.
    if batch_tile is None:
        batch_tile = min(_round_up(B, 8), 512)
    B_pad = _round_up(B, batch_tile)

    xp = jnp.pad(x, ((0, B_pad - B), (0, x_pad - x_dim)))
    ep = jnp.pad(eps, ((0, B_pad - B), (0, z_pad - z_dim)))

    n_hidden = len(padded["hidden"])
    kernel = _make_encoder_kernel(n_hidden, z_pad)

    in_specs = [pl.BlockSpec((batch_tile, x_pad), lambda i: (i, 0))]
    args = [xp]
    for (w, b) in padded["hidden"]:
        in_specs.append(pl.BlockSpec(w.shape, lambda i: (0, 0)))  # VMEM-resident
        in_specs.append(pl.BlockSpec(b.shape, lambda i: (0, 0)))
        args += [w, b]
    w_head, b_head = padded["head"]
    in_specs.append(pl.BlockSpec(w_head.shape, lambda i: (0, 0)))
    in_specs.append(pl.BlockSpec(b_head.shape, lambda i: (0, 0)))
    args += [w_head, b_head]
    in_specs.append(pl.BlockSpec((batch_tile, z_pad), lambda i: (i, 0)))
    args.append(ep)

    out = pl.pallas_call(
        kernel,
        out_shape=jax.ShapeDtypeStruct((B_pad, 3 * z_pad), jnp.float32),
        grid=(B_pad // batch_tile,),
        in_specs=in_specs,
        out_specs=pl.BlockSpec((batch_tile, 3 * z_pad), lambda i: (i, 0)),
        compiler_params=pltpu.CompilerParams(
            dimension_semantics=("parallel",)
        ),
    )(*args)

    z = out[:B, 0:z_dim]
    mu = out[:B, z_pad:z_pad + z_dim]
    log_var = out[:B, 2 * z_pad:2 * z_pad + z_dim]
    return z, mu, log_var


# ----------------------------------------------------------------------------
# Main
# ----------------------------------------------------------------------------
if __name__ == "__main__":
    key = jax.random.PRNGKey(0)
    B = 8
    x_dim, h_dims, z_dim = 32, [64, 32], 16
    dims = [x_dim, h_dims, z_dim]

    key, kp, kx, ke = jax.random.split(key, 4)
    params = init_encoder_params(kp, dims)
    padded = pad_encoder_params(params, dims)

    x = jax.random.normal(kx, (B, x_dim), jnp.float32)
    # TODO(synk): eps could be drawn in-kernel via pltpu.prng_seed +
    # pltpu.stateful_normal; kept as an explicit input for deterministic checks.
    eps = jax.random.normal(ke, (B, z_dim), jnp.float32)

    z, mu, log_var = encoder_forward(padded, x, eps)
    jax.block_until_ready((z, mu, log_var))

    # Pure-JAX reference of the same math (unpadded).
    h_ref = x
    for (w, b) in params["hidden"]:
        h_ref = jnp.maximum(h_ref @ w + b, 0.0)
    mu_ref = h_ref @ params["mu"][0] + params["mu"][1]
    lv_ref = jax.nn.softplus(h_ref @ params["log_var"][0] + params["log_var"][1])
    z_ref = mu_ref + jnp.exp(0.5 * lv_ref) * eps

    assert jnp.allclose(mu, mu_ref, atol=1e-4), "mu mismatch"
    assert jnp.allclose(log_var, lv_ref, atol=1e-4), "log_var mismatch"
    assert jnp.allclose(z, z_ref, atol=1e-4), "z mismatch"

    print("KERNEL_OK")
</pallas_src>

<mosaic_0001>
module attributes {stable_mosaic.version = 11 : i64} {
  func.func @kernel(%arg0: i32, %arg1: memref<8x128xf32, #tpu.memory_space<vmem>>, %arg2: memref<128x128xf32, #tpu.memory_space<vmem>>, %arg3: memref<1x128xf32, #tpu.memory_space<vmem>>, %arg4: memref<128x128xf32, #tpu.memory_space<vmem>>, %arg5: memref<1x128xf32, #tpu.memory_space<vmem>>, %arg6: memref<128x256xf32, #tpu.memory_space<vmem>>, %arg7: memref<1x256xf32, #tpu.memory_space<vmem>>, %arg8: memref<8x128xf32, #tpu.memory_space<vmem>>, %arg9: memref<8x384xf32, #tpu.memory_space<vmem>>) attributes {dimension_semantics = [#tpu.dimension_semantics<parallel>], iteration_bounds = array<i64: 1>, scalar_prefetch = 0 : i64, scratch_operands = 0 : i64, tpu.core_type = #tpu.core_type<tc>, window_params = [{transform_indices = @transform_0, window_bounds = array<i64: 8, 128>}, {pipeline_mode = #tpu.pipeline_mode<synchronous>, transform_indices = @transform_1, window_bounds = array<i64: 128, 128>}, {pipeline_mode = #tpu.pipeline_mode<synchronous>, transform_indices = @transform_2, window_bounds = array<i64: 1, 128>}, {pipeline_mode = #tpu.pipeline_mode<synchronous>, transform_indices = @transform_3, window_bounds = array<i64: 128, 128>}, {pipeline_mode = #tpu.pipeline_mode<synchronous>, transform_indices = @transform_4, window_bounds = array<i64: 1, 128>}, {pipeline_mode = #tpu.pipeline_mode<synchronous>, transform_indices = @transform_5, window_bounds = array<i64: 128, 256>}, {pipeline_mode = #tpu.pipeline_mode<synchronous>, transform_indices = @transform_6, window_bounds = array<i64: 1, 256>}, {transform_indices = @transform_7, window_bounds = array<i64: 8, 128>}, {transform_indices = @transform_8, window_bounds = array<i64: 8, 384>}]} {
    %c0 = arith.constant 0 : index
    %c0_0 = arith.constant 0 : index
    %0 = vector.load %arg1[%c0, %c0_0] : memref<8x128xf32, #tpu.memory_space<vmem>>, vector<8x128xf32>
    %c0_1 = arith.constant 0 : index
    %c0_2 = arith.constant 0 : index
    %1 = vector.load %arg2[%c0_1, %c0_2] : memref<128x128xf32, #tpu.memory_space<vmem>>, vector<128x128xf32>
    %cst = arith.constant dense<0.000000e+00> : vector<8x128xf32>
    %2 = tpu.matmul %0, %1, %cst {dimension_numbers = #tpu.dot_dimension_numbers<[1], [0], [0], [1], [0, 0, 1, 1], [], []>} : vector<8x128xf32>, vector<128x128xf32>, vector<8x128xf32> -> vector<8x128xf32>
    %c0_3 = arith.constant 0 : index
    %c0_4 = arith.constant 0 : index
    %3 = vector.load %arg3[%c0_3, %c0_4] : memref<1x128xf32, #tpu.memory_space<vmem>>, vector<1x128xf32>
    %4 = vector.broadcast %3 : vector<1x128xf32> to vector<8x128xf32>
    %5 = arith.addf %2, %4 : vector<8x128xf32>
    %cst_5 = arith.constant 0.000000e+00 : f32
    %6 = vector.broadcast %cst_5 : f32 to vector<8x128xf32>
    %7 = arith.maximumf %5, %6 : vector<8x128xf32>
    %c0_6 = arith.constant 0 : index
    %c0_7 = arith.constant 0 : index
    %8 = vector.load %arg4[%c0_6, %c0_7] : memref<128x128xf32, #tpu.memory_space<vmem>>, vector<128x128xf32>
    %cst_8 = arith.constant dense<0.000000e+00> : vector<8x128xf32>
    %9 = tpu.matmul %7, %8, %cst_8 {dimension_numbers = #tpu.dot_dimension_numbers<[1], [0], [0], [1], [0, 0, 1, 1], [], []>} : vector<8x128xf32>, vector<128x128xf32>, vector<8x128xf32> -> vector<8x128xf32>
    %c0_9 = arith.constant 0 : index
    %c0_10 = arith.constant 0 : index
    %10 = vector.load %arg5[%c0_9, %c0_10] : memref<1x128xf32, #tpu.memory_space<vmem>>, vector<1x128xf32>
    %11 = vector.broadcast %10 : vector<1x128xf32> to vector<8x128xf32>
    %12 = arith.addf %9, %11 : vector<8x128xf32>
    %cst_11 = arith.constant 0.000000e+00 : f32
    %13 = vector.broadcast %cst_11 : f32 to vector<8x128xf32>
    %14 = arith.maximumf %12, %13 : vector<8x128xf32>
    %c0_12 = arith.constant 0 : index
    %c0_13 = arith.constant 0 : index
    %15 = vector.load %arg6[%c0_12, %c0_13] : memref<128x256xf32, #tpu.memory_space<vmem>>, vector<128x256xf32>
    %cst_14 = arith.constant dense<0.000000e+00> : vector<8x256xf32>
    %16 = tpu.matmul %14, %15, %cst_14 {dimension_numbers = #tpu.dot_dimension_numbers<[1], [0], [0], [1], [0, 0, 1, 1], [], []>} : vector<8x128xf32>, vector<128x256xf32>, vector<8x256xf32> -> vector<8x256xf32>
    %c0_15 = arith.constant 0 : index
    %c0_16 = arith.constant 0 : index
    %17 = vector.load %arg7[%c0_15, %c0_16] : memref<1x256xf32, #tpu.memory_space<vmem>>, vector<1x256xf32>
    %18 = vector.broadcast %17 : vector<1x256xf32> to vector<8x256xf32>
    %19 = arith.addf %16, %18 : vector<8x256xf32>
    %20 = vector.extract_strided_slice %19 {offsets = [0, 0], sizes = [8, 128], strides = [1, 1]} : vector<8x256xf32> to vector<8x128xf32>
    %21 = vector.extract_strided_slice %19 {offsets = [0, 128], sizes = [8, 128], strides = [1, 1]} : vector<8x256xf32> to vector<8x128xf32>
    %cst_17 = arith.constant 0.000000e+00 : f32
    %22 = vector.broadcast %cst_17 : f32 to vector<8x128xf32>
    %23 = arith.maximumf %21, %22 : vector<8x128xf32>
    %24 = vector.broadcast %cst_17 : f32 to vector<8x128xf32>
    %25 = arith.subf %21, %24 : vector<8x128xf32>
    %26 = arith.cmpf one, %25, %25 : vector<8x128xf32>
    %27 = vector.broadcast %cst_17 : f32 to vector<8x128xf32>
    %28 = arith.addf %21, %27 : vector<8x128xf32>
    %29 = math.absf %25 : vector<8x128xf32>
    %cst_18 = arith.constant 0.000000e+00 : f32
    %30 = vector.broadcast %cst_18 : f32 to vector<8x128xf32>
    %31 = arith.subf %30, %29 : vector<8x128xf32>
    %32 = math.exp %31 : vector<8x128xf32>
    %33 = math.log1p %32 : vector<8x128xf32>
    %34 = arith.addf %23, %33 : vector<8x128xf32>
    %35 = arith.select %26, %28, %34 : vector<8x128xi1>, vector<8x128xf32>
    %cst_19 = arith.constant 5.000000e-01 : f32
    %36 = vector.broadcast %cst_19 : f32 to vector<8x128xf32>
    %37 = arith.mulf %36, %35 : vector<8x128xf32>
    %38 = math.exp %37 : vector<8x128xf32>
    %c0_20 = arith.constant 0 : index
    %c0_21 = arith.constant 0 : index
    %39 = vector.load %arg8[%c0_20, %c0_21] : memref<8x128xf32, #tpu.memory_space<vmem>>, vector<8x128xf32>
    %40 = arith.mulf %38, %39 : vector<8x128xf32>
    %41 = arith.addf %20, %40 : vector<8x128xf32>
    %c0_22 = arith.constant 0 : index
    %c0_23 = arith.constant 0 : index
    %42 = vector.load %arg9[%c0_22, %c0_23] : memref<8x384xf32, #tpu.memory_space<vmem>>, vector<8x128xf32>
    tpu.vector_store %arg9[%c0_22, %c0_23], %41 {strides = array<i32>} : memref<8x384xf32, #tpu.memory_space<vmem>>, vector<8x128xf32>,
    %c0_24 = arith.constant 0 : index
    %c128 = arith.constant 128 : index
    %43 = vector.load %arg9[%c0_24, %c128] : memref<8x384xf32, #tpu.memory_space<vmem>>, vector<8x128xf32>
    tpu.vector_store %arg9[%c0_24, %c128], %20 {strides = array<i32>} : memref<8x384xf32, #tpu.memory_space<vmem>>, vector<8x128xf32>,
    %c0_25 = arith.constant 0 : index
    %c256 = arith.constant 256 : index
    %44 = vector.load %arg9[%c0_25, %c256] : memref<8x384xf32, #tpu.memory_space<vmem>>, vector<8x128xf32>
    tpu.vector_store %arg9[%c0_25, %c256], %35 {strides = array<i32>} : memref<8x384xf32, #tpu.memory_space<vmem>>, vector<8x128xf32>,
    return
  }
  func.func @transform_0(%arg0: i32) -> (i32, i32) {
    %c0_i32 = arith.constant 0 : i32
    %c0_i32_0 = arith.constant 0 : i32
    return %arg0, %c0_i32 : i32, i32
  }
  func.func @transform_1(%arg0: i32) -> (i32, i32) {
    %c0_i32 = arith.constant 0 : i32
    %c0_i32_0 = arith.constant 0 : i32
    %c0_i32_1 = arith.constant 0 : i32
    return %c0_i32, %c0_i32_0 : i32, i32
  }
  func.func @transform_2(%arg0: i32) -> (i32, i32) {
    %c0_i32 = arith.constant 0 : i32
    %c0_i32_0 = arith.constant 0 : i32
    %c0_i32_1 = arith.constant 0 : i32
    return %c0_i32, %c0_i32_0 : i32, i32
  }
  func.func @transform_3(%arg0: i32) -> (i32, i32) {
    %c0_i32 = arith.constant 0 : i32
    %c0_i32_0 = arith.constant 0 : i32
    %c0_i32_1 = arith.constant 0 : i32
    return %c0_i32, %c0_i32_0 : i32, i32
  }
  func.func @transform_4(%arg0: i32) -> (i32, i32) {
    %c0_i32 = arith.constant 0 : i32
    %c0_i32_0 = arith.constant 0 : i32
    %c0_i32_1 = arith.constant 0 : i32
    return %c0_i32, %c0_i32_0 : i32, i32
  }
  func.func @transform_5(%arg0: i32) -> (i32, i32) {
    %c0_i32 = arith.constant 0 : i32
    %c0_i32_0 = arith.constant 0 : i32
    %c0_i32_1 = arith.constant 0 : i32
    return %c0_i32, %c0_i32_0 : i32, i32
  }
  func.func @transform_6(%arg0: i32) -> (i32, i32) {
    %c0_i32 = arith.constant 0 : i32
    %c0_i32_0 = arith.constant 0 : i32
    %c0_i32_1 = arith.constant 0 : i32
    return %c0_i32, %c0_i32_0 : i32, i32
  }
  func.func @transform_7(%arg0: i32) -> (i32, i32) {
    %c0_i32 = arith.constant 0 : i32
    %c0_i32_0 = arith.constant 0 : i32
    return %arg0, %c0_i32 : i32, i32
  }
  func.func @transform_8(%arg0: i32) -> (i32, i32) {
    %c0_i32 = arith.constant 0 : i32
    %c0_i32_0 = arith.constant 0 : i32
    return %arg0, %c0_i32 : i32, i32
  }
}

</mosaic_0001>

<bundles_post_ra>
// kernel: tpu_custom_call.1
= control target key start
LH: loop header
LB: loop body
LE: loop exit
PB: predicated region body
PF: predicated region fallthrough
CT: control target
= control target key end

     0   :  { %13 = vsyncpa [#allocation3], 0  ;;  %s780_s0 = inlined_call_operand.hbm [shape: f32[8,128], index: 0, kind: input, shape index: {}]   ;;  %s781_s1 = inlined_call_operand.hbm [shape: f32[128,128], index: 1, kind: input, shape index: {}]   ;;  %s782_s2 = inlined_call_operand.vmem [shape: f32[1,128], index: 2, kind: input, shape index: {}]   ;;  %s783_s3 = inlined_call_operand.hbm [shape: f32[128,128], index: 3, kind: input, shape index: {}]   ;;  %s784_s4 = inlined_call_operand.vmem [shape: f32[1,128], index: 4, kind: input, shape index: {}]   ;;  %s785_s5 = inlined_call_operand.hbm [shape: f32[128,256], index: 5, kind: input, shape index: {}]   ;;  %s786_s6 = inlined_call_operand.vmem [shape: f32[1,256], index: 6, kind: input, shape index: {}]   ;;  %s787_s7 = inlined_call_operand.vmem [shape: f32[8,128], index: 7, kind: input, shape index: {}]   ;;  %s788_s8 = inlined_call_operand.hbm [shape: f32[8,384], index: 8, kind: output, shape index: {}]  }
   0x1   :  { %14 = vsyncpa [#allocation6], 0 }
   0x2   :  { %15 = vsyncpa [#allocation9], 0 }
   0x3   :  { %16 = vsyncpa [#allocation4], 0  ;;  %s662_s27 = smov [#allocation5]  }
   0x4   :  { %s32_s28 = sshll.u32 %s662_s27, 4  ;;  %s33_s28 = int_to_ptr.vmem [resolvable:$true] %s32_s28 }
   0x5   :  { %s562_s29 = scalar_lea.vmem %s33_s28, 2048  ;;  %p567_p1 = scmp.lt.s32.totalorder %s33_s28, %s33_s28 }
   0x6   :  { %p563_p0 = scmp.ne.s32.totalorder %s33_s28, %s562_s29  ;;  %p568_p2 = scmp.lt.s32.totalorder %s562_s29, %s562_s29 }
   0x8   :  { %p569_p3 = por %p568_p2, %p567_p1 }
   0xa   :  { %p570_p4 = pnand %p569_p3, %p563_p0 }
   0xc   :  { %573 = shalt.err (!%p570_p4)
}
   0xd   :  { %s663_s30 = smov 128   ;;  %s664_s9 = smov 8  }
   0xe   :  { %38 = dma.hbm_to_vmem [thread:$0]  %s781_s1, 2048, %s33_s28, [#allocation6], %s663_s30, %s663_s30, %s664_s9  }
   0xf   :  { %s665_s12 = smov [#allocation2]   ;;  %s666_s14 = smov [#allocation7]  }
  0x10   :  { %s23_s13 = sshll.u32 %s665_s12, 4  ;;  %s46_s15 = sshll.u32 %s666_s14, 4  ;;  %s24_s13 = int_to_ptr.vmem [resolvable:$true] %s23_s13  ;;  %s47_s15 = int_to_ptr.vmem [resolvable:$true] %s46_s15 }
  0x11   :  { %s582_s16 = scalar_lea.vmem %s24_s13, 128  ;;  %p587_p6 = scmp.lt.s32.totalorder %s24_s13, %s24_s13 }
  0x12   :  { %p583_p5 = scmp.ne.s32.totalorder %s24_s13, %s582_s16  ;;  %p588_p7 = scmp.lt.s32.totalorder %s582_s16, %s582_s16 }
  0x14   :  { %p589_p8 = por %p588_p7, %p587_p6 }
  0x16   :  { %p590_p9 = pnand %p589_p8, %p583_p5 }
  0x18   :  { %593 = shalt.err (!%p590_p9)
}
  0x19   :  { %26 = dma.hbm_to_vmem [thread:$0]  %s780_s0, 128, %s24_s13, [#allocation3]  }
  0x1a   :  { %s602_s19 = scalar_lea.vmem %s47_s15, 2048  ;;  %p607_p11 = scmp.lt.s32.totalorder %s47_s15, %s47_s15 }
  0x1b   :  { %p603_p10 = scmp.ne.s32.totalorder %s47_s15, %s602_s19  ;;  %p608_p12 = scmp.lt.s32.totalorder %s602_s19, %s602_s19 }
  0x1d   :  { %p609_p13 = por %p608_p12, %p607_p11 }
  0x1f   :  { %p610_p0 = pnand %p609_p13, %p603_p10 }
  0x21   :  { %613 = shalt.err (!%p610_p0)
}
  0x22   :  { %52 = dma.hbm_to_vmem [thread:$0]  %s783_s3, 2048, %s47_s15, [#allocation6], %s663_s30, %s663_s30, %s664_s9  }
  0x23   :  { %s667_s21 = smov [#allocation8]  }
  0x24   :  { %s60_s22 = sshll.u32 %s667_s21, 4  ;;  %s61_s22 = int_to_ptr.vmem [resolvable:$true] %s60_s22 }
  0x25   :  { %s622_s23 = scalar_lea.vmem %s61_s22, 4096  ;;  %p627_p2 = scmp.lt.s32.totalorder %s61_s22, %s61_s22 }
  0x26   :  { %p623_p1 = scmp.ne.s32.totalorder %s61_s22, %s622_s23  ;;  %p628_p3 = scmp.lt.s32.totalorder %s622_s23, %s622_s23 }
  0x28   :  { %p629_p4 = por %p628_p3, %p627_p2 }
  0x2a   :  { %p630_p5 = pnand %p629_p4, %p623_p1 }
  0x2c   :  { %633 = shalt.err (!%p630_p5)
}
  0x2d   :  { %s668_s0 = smov 256   ;;  %s669_s24 = smov 16  }
  0x2e   :  { %66 = dma.hbm_to_vmem [thread:$0]  %s785_s5, 4096, %s61_s22, [#allocation9], %s668_s0, %s668_s0, %s669_s24  }
  0x2f   :  { %654 = dma.done.wait [#allocation3], 128  }
  0x30   :  { %655 = vsyncadd [#allocation3], 4294967168 }
  0x31   :  { %656 = dma.done.wait [#allocation6], 4096  }
  0x32   :  { %657 = vsyncadd [#allocation6], 4294963200 }
  0x33   :  { %658 = dma.done.wait [#allocation9], 4096  }
  0x34   :  { %659 = vsyncadd [#allocation9], 4294963200  ;;  %v670_v0 = vmov 0.0   ;;  %vm671_vm0 = vmmov 0   ;;  %v99_v1 = vld [vmem:[#allocation5 + $0x78] sm:$0xff]  ;;  %v98_v2 = vld [vmem:[#allocation5 + $0x70] sm:$0xff] }
  0x35   :  { %467 = vmatprep.subr.mxu0 %v670_v0  ;;  %499 = vmatprep.mubr.msk.f32.mxu0 %vm671_vm0, %v670_v0  ;;  %v97_v3 = vld [vmem:[#allocation5 + $0x68] sm:$0xff]  ;;  %v96_v4 = vld [vmem:[#allocation5 + $0x60] sm:$0xff]  ;;  %v193_v5 = vld [vmem:[#allocation7 + $0x78] sm:$0xff]  ;;  %s672_s30 = smov [#allocation10]  }
  0x36   :  { %502 = vmatprep.subr.mxu1 %v670_v0  ;;  %534 = vmatprep.mubr.msk.f32.mxu1 %vm671_vm0, %v670_v0  ;;  %v95_v6 = vld [vmem:[#allocation5 + $0x58] sm:$0xff]  ;;  %v192_v7 = vld [vmem:[#allocation7 + $0x70] sm:$0xff]  ;;  %v191_v8 = vld [vmem:[#allocation7 + $0x68] sm:$0xff]  ;;  %s420_s9 = sshll.u32 %s672_s30, 4  ;;  %s421_s9 = int_to_ptr.vmem [resolvable:$true] %s420_s9 }
  0x37   :  { %468 = vmatpush3.msra.mxu0 %v99_v1  ;;  %503 = vmatpush3.msra.mxu1 %v193_v5  ;;  %v94_v9 = vld [vmem:[#allocation5 + $0x50] sm:$0xff]  ;;  %v190_v10 = vld [vmem:[#allocation7 + $0x60] sm:$0xff]  ;;  %v93_v11 = vld [vmem:[#allocation5 + $0x48] sm:$0xff]  ;;  %s634_s10 = scalar_lea.vmem %s421_s9, 384  ;;  %p639_p7 = scmp.lt.s32.totalorder %s421_s9, %s421_s9 }
  0x38   :  { %469 = vmatprep.subr.mxu0 %v670_v0  ;;  %504 = vmatprep.subr.mxu1 %v670_v0  ;;  %v189_v12 = vld [vmem:[#allocation7 + $0x58] sm:$0xff]  ;;  %v92_v13 = vld [vmem:[#allocation5 + $0x40] sm:$0xff]  ;;  %v188_v14 = vld [vmem:[#allocation7 + $0x50] sm:$0xff]  ;;  %p635_p6 = scmp.ne.s32.totalorder %s421_s9, %s634_s10  ;;  %p640_p8 = scmp.lt.s32.totalorder %s634_s10, %s634_s10 }
  0x39   :  { %470 = vmatpush3.msra.mxu0 %v98_v2  ;;  %505 = vmatpush3.msra.mxu1 %v192_v7  ;;  %v91_v15 = vld [vmem:[#allocation5 + $0x38] sm:$0xff]  ;;  %v187_v16 = vld [vmem:[#allocation7 + $0x48] sm:$0xff]  ;;  %v90_v17 = vld [vmem:[#allocation5 + $0x30] sm:$0xff] }
  0x3a   :  { %471 = vmatprep.subr.mxu0 %v670_v0  ;;  %506 = vmatprep.subr.mxu1 %v670_v0  ;;  %v186_v18 = vld [vmem:[#allocation7 + $0x40] sm:$0xff]  ;;  %v89_v19 = vld [vmem:[#allocation5 + $0x28] sm:$0xff]  ;;  %v185_v20 = vld [vmem:[#allocation7 + $0x38] sm:$0xff]  ;;  %p641_p9 = por %p640_p8, %p639_p7 }
  0x3b   :  { %472 = vmatpush3.msra.mxu0 %v97_v3  ;;  %507 = vmatpush3.msra.mxu1 %v191_v8  ;;  %v88_v21 = vld [vmem:[#allocation5 + $0x20] sm:$0xff]  ;;  %v184_v22 = vld [vmem:[#allocation7 + $0x30] sm:$0xff]  ;;  %v87_v23 = vld [vmem:[#allocation5 + $0x18] sm:$0xff] }
  0x3c   :  { %473 = vmatprep.subr.mxu0 %v670_v0  ;;  %508 = vmatprep.subr.mxu1 %v670_v0  ;;  %v183_v24 = vld [vmem:[#allocation7 + $0x28] sm:$0xff]  ;;  %v86_v25 = vld [vmem:[#allocation5 + $0x10] sm:$0xff]  ;;  %v182_v26 = vld [vmem:[#allocation7 + $0x20] sm:$0xff]  ;;  %p642_p10 = pnand %p641_p9, %p635_p6 }
  0x3d   :  { %474 = vmatpush3.msra.mxu0 %v96_v4  ;;  %509 = vmatpush3.msra.mxu1 %v190_v10  ;;  %v85_v27 = vld [vmem:[#allocation5 + $0x8] sm:$0xff]  ;;  %v181_v28 = vld [vmem:[#allocation7 + $0x18] sm:$0xff]  ;;  %v84_v29 = vld [vmem:[#allocation5] sm:$0xff] }
  0x3e   :  { %475 = vmatprep.subr.mxu0 %v670_v0  ;;  %510 = vmatprep.subr.mxu1 %v670_v0  ;;  %v83_v30 = vld [vmem:[#allocation2] sm:$0xff]  ;;  %v180_v31 = vld [vmem:[#allocation7 + $0x10] sm:$0xff]  ;;  %v179_v32 = vld [vmem:[#allocation7 + $0x8] sm:$0xff] }
  0x3f   :  { %476 = vmatpush3.msra.mxu0 %v95_v6  ;;  %511 = vmatpush3.msra.mxu1 %v189_v12  ;;  %v178_v33 = vld [vmem:[#allocation7] sm:$0xff]  ;;  %v303_v34 = vld [vmem:[#allocation8 + $0xf8] sm:$0xff]  ;;  %v302_v35 = vld [vmem:[#allocation8 + $0xf0] sm:$0xff]  ;;  %v306_v12 = vlaneseq }
  0x40   :  { %477 = vmatprep.subr.mxu0 %v670_v0  ;;  %512 = vmatprep.subr.mxu1 %v670_v0  ;;  %v301_v36 = vld [vmem:[#allocation8 + $0xe8] sm:$0xff]  ;;  %v300_v37 = vld [vmem:[#allocation8 + $0xe0] sm:$0xff]  ;;  %v299_v38 = vld [vmem:[#allocation8 + $0xd8] sm:$0xff] }
  0x41   :  { %478 = vmatpush3.msra.mxu0 %v94_v9  ;;  %513 = vmatpush3.msra.mxu1 %v188_v14  ;;  %v298_v39 = vld [vmem:[#allocation8 + $0xd0] sm:$0xff]  ;;  %v297_v40 = vld [vmem:[#allocation8 + $0xc8] sm:$0xff]  ;;  %v296_v41 = vld [vmem:[#allocation8 + $0xc0] sm:$0xff] }
  0x42   :  { %479 = vmatprep.subr.mxu0 %v670_v0  ;;  %514 = vmatprep.subr.mxu1 %v670_v0  ;;  %v295_v42 = vld [vmem:[#allocation8 + $0xb8] sm:$0xff]  ;;  %v294_v43 = vld [vmem:[#allocation8 + $0xb0] sm:$0xff]  ;;  %v293_v44 = vld [vmem:[#allocation8 + $0xa8] sm:$0xff] }
  0x43   :  { %480 = vmatpush3.msra.mxu0 %v93_v11  ;;  %515 = vmatpush3.msra.mxu1 %v187_v16  ;;  %v292_v45 = vld [vmem:[#allocation8 + $0xa0] sm:$0xff]  ;;  %v291_v46 = vld [vmem:[#allocation8 + $0x98] sm:$0xff]  ;;  %v290_v47 = vld [vmem:[#allocation8 + $0x90] sm:$0xff] }
  0x44   :  { %481 = vmatprep.subr.mxu0 %v670_v0  ;;  %516 = vmatprep.subr.mxu1 %v670_v0  ;;  %v289_v48 = vld [vmem:[#allocation8 + $0x88] sm:$0xff]  ;;  %v288_v49 = vld [vmem:[#allocation8 + $0x80] sm:$0xff]  ;;  %v287_v50 = vld [vmem:[#allocation8 + $0x78] sm:$0xff] }
  0x45   :  { %482 = vmatpush3.msra.mxu0 %v92_v13  ;;  %517 = vmatpush3.msra.mxu1 %v186_v18  ;;  %v286_v51 = vld [vmem:[#allocation8 + $0x70] sm:$0xff]  ;;  %v285_v52 = vld [vmem:[#allocation8 + $0x68] sm:$0xff]  ;;  %v284_v53 = vld [vmem:[#allocation8 + $0x60] sm:$0xff]  ;;  %v307_v13 = vshrl.u32 %v306_v12, 7 }
  0x46   :  { %483 = vmatprep.subr.mxu0 %v670_v0  ;;  %518 = vmatprep.subr.mxu1 %v670_v0  ;;  %v283_v54 = vld [vmem:[#allocation8 + $0x58] sm:$0xff]  ;;  %v282_v55 = vld [vmem:[#allocation8 + $0x50] sm:$0xff]  ;;  %v281_v56 = vld [vmem:[#allocation8 + $0x48] sm:$0xff] }
  0x47   :  { %484 = vmatpush3.msra.mxu0 %v91_v15  ;;  %519 = vmatpush3.msra.mxu1 %v185_v20  ;;  %v280_v57 = vld [vmem:[#allocation8 + $0x40] sm:$0xff]  ;;  %v279_v58 = vld [vmem:[#allocation8 + $0x38] sm:$0xff]  ;;  %v278_v59 = vld [vmem:[#allocation8 + $0x30] sm:$0xff]  ;;  %v308_v14 = vsub.s32 0, %v307_v13  ;;  %v312_v16 = vsub.s32 1, %v307_v13 }
  0x48   :  { %485 = vmatprep.subr.mxu0 %v670_v0  ;;  %520 = vmatprep.subr.mxu1 %v670_v0  ;;  %v277_v60 = vld [vmem:[#allocation8 + $0x28] sm:$0xff]  ;;  %v431_v61 = vld [vmem:[%s782_s2] ss:$0 sm:$0xff]  ;;  %v276_v2 = vld [vmem:[#allocation8 + $0x20] sm:$0xff] }
  0x49   :  { %486 = vmatpush3.msra.mxu0 %v90_v17  ;;  %521 = vmatpush3.msra.mxu1 %v184_v22  ;;  %v275_v3 = vld [vmem:[#allocation8 + $0x18] sm:$0xff]  ;;  %v274_v4 = vld [vmem:[#allocation8 + $0x10] sm:$0xff]  ;;  %v273_v5 = vld [vmem:[#allocation8 + $0x8] sm:$0xff] }
  0x4a   :  { %487 = vmatprep.subr.mxu0 %v670_v0  ;;  %522 = vmatprep.subr.mxu1 %v670_v0  ;;  %v272_v6 = vld [vmem:[#allocation8] sm:$0xff]  ;;  %v432_v7 = vld [vmem:[%s784_s4] ss:$0 sm:$0xff] }
  0x4b   :  { %488 = vmatpush3.msra.mxu0 %v89_v19  ;;  %523 = vmatpush3.msra.mxu1 %v183_v24  ;;  %v304_v15 = vld [vmem:[%s786_s6] sm:$0x3] }
  0x4c   :  { %489 = vmatprep.subr.mxu0 %v670_v0  ;;  %524 = vmatprep.subr.mxu1 %v670_v0  ;;  %v309_v17 = vrot.slane %v304_v15, %v308_v14  ;;  %v313_v18 = vrot.slane %v304_v15, %v312_v16 }
  0x4d   :  { %490 = vmatpush3.msra.mxu0 %v88_v21  ;;  %525 = vmatpush3.msra.mxu1 %v182_v26 }
  0x4e   :  { %491 = vmatprep.subr.mxu0 %v670_v0  ;;  %526 = vmatprep.subr.mxu1 %v670_v0 }
  0x4f   :  { %492 = vmatpush3.msra.mxu0 %v87_v23  ;;  %527 = vmatpush3.msra.mxu1 %v181_v28 }
  0x50   :  { %493 = vmatprep.subr.mxu0 %v670_v0  ;;  %528 = vmatprep.subr.mxu1 %v670_v0 }
  0x51   :  { %494 = vmatpush3.msra.mxu0 %v86_v25  ;;  %529 = vmatpush3.msra.mxu1 %v180_v31 }
  0x52   :  { %495 = vmatprep.subr.mxu0 %v670_v0  ;;  %530 = vmatprep.subr.mxu1 %v670_v0 }
  0x53   :  { %496 = vmatpush3.msra.mxu0 %v85_v27  ;;  %531 = vmatpush3.msra.mxu1 %v179_v32 }
  0x54   :  { %497 = vmatprep.subr.mxu0 %v670_v0  ;;  %532 = vmatprep.subr.mxu1 %v670_v0 }
  0x55   :  { %498 = vmatpush3.msra.mxu0 %v84_v29  ;;  %533 = vmatpush3.msra.mxu1 %v178_v33 }
  0x56   :  { %500 = vmatmul.mubr.f32.vlgmr.msra.gmra.mxu0 %v83_v30  ;;  %316 = vmatprep.subr.mxu0 %v303_v34 }
  0x57   :  { %380 = vmatprep.mubr.f32.mxu0 %v670_v0  ;;  %317 = vmatpush1.msra.mxu0 %v302_v35 }
  0x58   :  { %318 = vmatprep.subr.mxu0 %v301_v36 }
  0x59   :  { %319 = vmatpush1.msra.mxu0 %v300_v37 }
  0x5a   :  { %320 = vmatprep.subr.mxu0 %v299_v38 }
  0x5b   :  { %321 = vmatpush1.msra.mxu0 %v298_v39 }
  0x5c   :  { %322 = vmatprep.subr.mxu0 %v297_v40  ;;  %v408_v40 = vld [vmem:[%s787_s7] sm:$0xff] }
  0x5d   :  { %323 = vmatpush1.msra.mxu0 %v296_v41 }
  0x5e   :  { %324 = vmatprep.subr.mxu0 %v295_v42 }
  0x5f   :  { %325 = vmatpush1.msra.mxu0 %v294_v43 }
  0x60   :  { %326 = vmatprep.subr.mxu0 %v293_v44 }
  0x61   :  { %327 = vmatpush1.msra.mxu0 %v292_v45 }
  0x62   :  { %328 = vmatprep.subr.mxu0 %v291_v46 }
  0x63   :  { %329 = vmatpush1.msra.mxu0 %v290_v47 }
  0x64   :  { %330 = vmatprep.subr.mxu0 %v289_v48 }
  0x65   :  { %331 = vmatpush1.msra.mxu0 %v288_v49 }
  0x66   :  { %332 = vmatprep.subr.mxu0 %v287_v50 }
  0x67   :  { %333 = vmatpush1.msra.mxu0 %v286_v51 }
  0x68   :  { %334 = vmatprep.subr.mxu0 %v285_v52 }
  0x69   :  { %335 = vmatpush1.msra.mxu0 %v284_v53 }
  0x6a   :  { %336 = vmatprep.subr.mxu0 %v283_v54 }
  0x6b   :  { %337 = vmatpush1.msra.mxu0 %v282_v55 }
  0x6c   :  { %338 = vmatprep.subr.mxu0 %v281_v56 }
  0x6d   :  { %339 = vmatpush1.msra.mxu0 %v280_v57 }
  0x6e   :  { %340 = vmatprep.subr.mxu0 %v279_v58 }
  0x6f   :  { %341 = vmatpush1.msra.mxu0 %v278_v59 }
  0x70   :  { %342 = vmatprep.subr.mxu0 %v277_v60 }
  0x71   :  { %343 = vmatpush1.msra.mxu0 %v276_v2 }
  0x72   :  { %344 = vmatprep.subr.mxu0 %v275_v3 }
  0x73   :  { %345 = vmatpush1.msra.mxu0 %v274_v4 }
  0x74   :  { %346 = vmatprep.subr.mxu0 %v273_v5 }
  0x75   :  { %347 = vmatpush1.msra.mxu0 %v272_v6 }
 0x116   :  { %v173_v62 = vpop.f32.mrf.mxu0 }
 0x117   :  { %v174_v63 = vadd.f32 %v431_v61, %v173_v62 }
 0x118   :  { %v501_v0 = vpop.f32.mrf.mxu0 }
 0x119   :  { %v177_v1 = vmax.f32 %v174_v63, 0.0 }
 0x11b   :  { %535 = vmatmul.mubr.f32.vlgmr.msra.gmra.mxu1 %v177_v1 }
 0x1db   :  { %v267_v8 = vpop.f32.mrf.mxu1 }
 0x1dc   :  { %v268_v9 = vadd.f32 %v432_v7, %v267_v8 }
 0x1dd   :  { %v536_v10 = vpop.f32.mrf.mxu1 }
 0x1de   :  { %v271_v11 = vmax.f32 %v268_v9, 0.0 }
 0x1e0   :  { %381 = vmatmul.mubr.f32.vlgmr.msra.gmra.mxu0 %v271_v11 }
 0x2a0   :  { %v382_v19 = vpop.f32.mrf.mxu0 }
 0x2a1   :  { %v383_v20 = vadd.f32 %v382_v19, %v309_v17 }
 0x2a2   :  { %v384_v21 = vpop.f32.mrf.mxu0 }
 0x2a3   :  { %412 = vst [vmem:[#allocation10 + $0x8] sm:$0xff] %v383_v20  ;;  %v385_v22 = vadd.f32 %v384_v21, %v313_v18 }
 0x2a5   :  { %v390_v23 = vand.u32 2147483647, %v385_v22  ;;  %v387_v34 = vmax.f32 %v385_v22, 0.0  ;;  %vm388_vm2 = vcmp.ne.f32.partialorder %v385_v22, %v385_v22 }
 0x2a7   :  { %v391_v24 = vsub.f32 0.0, %v390_v23 }
 0x2a9   :  { %v392_v25 = vmul.f32 1.442695, %v391_v24 }
 0x2ab   :  { %548 = vpow2.f32 %v392_v25 }
 0x2b8   :  { %v549_v26 = vpop.eup %548 }
 0x2b9   :  { %v394_v27 = vadd.f32 1.0, %v549_v26  ;;  %v397_v28 = vmul.f32 -0.5, %v549_v26  ;;  %v400_v30 = vand.u32 2147483647, %v549_v26 }
 0x2bb   :  { %550 = vlog2.f32 %v394_v27  ;;  %v398_v29 = vadd.f32 1.0, %v397_v28  ;;  %vm401_vm1 = vcmp.lt.f32.partialorder %v400_v30, 0.0004427343 }
 0x2bd   :  { %v399_v33 = vmul.f32 %v549_v26, %v398_v29 }
 0x2c8   :  { %v551_v31 = vpop.eup %550 }
 0x2c9   :  { %v396_v32 = vmul.f32 0.6931472, %v551_v31 }
 0x2cb   :  { %v402_v35 = vsel %vm401_vm1, %v399_v33, %v396_v32 }
 0x2cc   :  { %v403_v36 = vadd.f32 %v402_v35, %v387_v34 }
 0x2ce   :  { %v404_v37 = vsel %vm388_vm2, %v385_v22, %v403_v36 }
 0x2cf   :  { %v405_v38 = vmul.f32 0.5, %v404_v37  ;;  %413 = vst [vmem:[#allocation10 + $0x10] sm:$0xff] %v404_v37 }
 0x2d1   :  { %v406_v39 = vmul.f32 1.442695, %v405_v38 }
 0x2d3   :  { %552 = vpow2.f32 %v406_v39 }
 0x2e0   :  { %v553_v41 = vpop.eup %552 }
 0x2e1   :  { %v409_v42 = vmul.f32 %v553_v41, %v408_v40 }
 0x2e3   :  { %v410_v43 = vadd.f32 %v409_v42, %v383_v20 }
 0x2e5   :  { %411 = vst [vmem:[#allocation10] sm:$0xff] %v410_v43 }
 0x2e6   :  { %645 = shalt.err (!%p642_p10)
}
 0x2e7   :  { %423 = dma.vmem_to_hbm [thread:$0]  %s421_s9, 384, %s788_s8, [#allocation4]  }
 0x2e8   :  { %660 = dma.done.wait [#allocation4], 384  }
 0x2e9   :  { %661 = vsyncadd [#allocation4], 4294966912 }
 0x2ea   :  { %427 = vsyncpa [#allocation3], 1 }
 0x2eb   :  { %428 = vsyncpa [#allocation6], 1 }
 0x2ec   :  { %429 = vsyncpa [#allocation9], 1 }
 0x2ed   :  { %430 = vsyncpa [#allocation4], 1 }

</bundles_post_ra>
